<compile_context>
chip_gen: v6e
topology: v6e:2x2x1
jax: 0.10.0
libtpu: 0.0.40
codegen_flags: <defaults>
</compile_context>

<pallas_src>
import functools

import jax
import jax.numpy as jnp
from jax.experimental import pallas as pl
from jax.experimental.pallas import tpu as pltpu


def _ceil_to(x, m):
    return ((x + m - 1) // m) * m


# ----------------------------------------------------------------------------
# Kernel 1: fused 3x3 conv (stride 1) + BN shift + ReLU, flat padded layout.
#   Input image is zero padded and flattened to (L, Cin) with row pitch `wr`
#   (multiple of 16).  Output flat index q = ho*wr + wo; tap (di, dj) input is
#   the static slice [q + di*wr + dj] of one window loaded per tile, so the
#   body is an uninterrupted `acc += dot(...)` chain into the f32 accumulator.
#   If fold: the 3 dj taps are concatenated along channels -> K = 3*Cin.
# ----------------------------------------------------------------------------
def _conv3x3_s1_kernel(x_ref, w_ref, b_ref, o_ref, *, tm, wr, fold):
    # x_ref: (1, L, Cin)                 bf16  whole padded flat image (resident)
    # w_ref: (9, Cin, tc) or (3, 3Cin, tc) bf16 (BN scale folded in)
    # b_ref: (1, tc)                     f32   BN shift
    # o_ref: (1, tm, tc)                 bf16
    q0 = pl.multiple_of(pl.program_id(2) * tm, 16)
    xwin = x_ref[0, pl.ds(q0, tm + 2 * wr + 16), :]          # one load per tile
    acc = None
    for di in range(3):
        base = di * wr
        if fold:
            xcat = jnp.concatenate(
                [xwin[base + dj:base + dj + tm, :] for dj in range(3)], axis=1)
            z = jnp.dot(xcat, w_ref[di], preferred_element_type=jnp.float32)
            acc = z if acc is None else acc + z
        else:
            for dj in range(3):
                z = jnp.dot(xwin[base + dj:base + dj + tm, :],
                            w_ref[di * 3 + dj],
                            preferred_element_type=jnp.float32)
                acc = z if acc is None else acc + z
    o_ref[0] = jnp.maximum(acc + b_ref[...], 0.0).astype(o_ref.dtype)


def conv3x3_s1(x, w, shift):
    """Stride-1 3x3 conv + BN shift + ReLU.

    x: (N,H,W,Cin) bf16; w: (9,Cin,Cout) or (3,3*Cin,Cout) bf16; shift: (Cout,) f32.
    """
    N, H, W, Cin = x.shape
    Cout = w.shape[-1]
    fold = (w.shape[0] == 3)
    assert w.shape[1] == (3 * Cin if fold else Cin)

    wr = _ceil_to(W + 2, 16)                 # padded row pitch (16-aligned)
    mq = H * wr                              # valid flat output length
    tm = min(1024, _ceil_to(mq, 16))
    mpad = _ceil_to(mq, tm)
    L = mpad + 2 * wr + 16                   # flat input length incl. halo

    # zero pad: 1 row top/bottom, 1 col left, (wr - W - 1) cols right; flatten.
    xp = jnp.pad(x, ((0, 0), (1, 1), (1, wr - W - 1), (0, 0)))
    xf = xp.reshape(N, (H + 2) * wr, Cin)
    xf = jnp.pad(xf, ((0, 0), (0, L - (H + 2) * wr), (0, 0)))

    tc = Cout if Cout <= 256 else 256
    assert Cout % tc == 0
    shift2 = shift.reshape(1, Cout).astype(jnp.float32)

    kernel = functools.partial(_conv3x3_s1_kernel, tm=tm, wr=wr, fold=fold)
    out_flat = pl.pallas_call(
        kernel,
        out_shape=jax.ShapeDtypeStruct((N, mpad, Cout), jnp.bfloat16),
        grid=(Cout // tc, N, mpad // tm),
        in_specs=[
            pl.BlockSpec((1, L, Cin), lambda c, n, m: (n, 0, 0)),
            pl.BlockSpec((w.shape[0], w.shape[1], tc), lambda c, n, m: (0, 0, c)),
            pl.BlockSpec((1, tc), lambda c, n, m: (0, c)),
        ],
        out_specs=pl.BlockSpec((1, tm, tc), lambda c, n, m: (n, m, c)),
        compiler_params=pltpu.CompilerParams(
            dimension_semantics=("parallel", "parallel", "parallel"),
            vmem_limit_bytes=40 * 1024 * 1024,
        ),
    )(xf, w, shift2)

    return out_flat[:, :mq, :].reshape(N, H, wr, Cout)[:, :, :W, :]


# ----------------------------------------------------------------------------
# Kernel 2: fused 3x3 conv (stride 2) + BN shift + ReLU, column-pair layout.
#   x is viewed (free reshape) as (H, W/2, 2*Cin): pair p = cols (2p, 2p+1).
#   After a 1-row / 1-pair zero pad, output (ho, wo) reads padded rows
#   2ho..2ho+2 and padded pairs wo, wo+1, so each output row is 3x2 contiguous
#   MXU matmuls with K = 2*Cin (weights carry the per-phase taps, one zero
#   half-block).  Each grid step produces tr output rows directly at stride 2.
# ----------------------------------------------------------------------------
def _conv3x3_s2_kernel(x_ref, w_ref, b_ref, o_ref, *, tr, wo_pad):
    # x_ref: (1, Hp, Wp2, 2Cin)  bf16  whole padded pair-view image (resident)
    # w_ref: (6, 2Cin, tc)       bf16  [di*2 + pair_tap], BN scale folded in
    # b_ref: (1, tc)             f32
    # o_ref: (1, tr, wo_pad, tc) bf16
    r0 = pl.program_id(2) * tr
    # All padded input rows needed by this block of tr output rows, loaded once.
    xrows = x_ref[0, pl.ds(2 * r0, 2 * tr + 2), :, :]         # (2tr+2, Wp2, 2Cin)
    xr0 = xrows[:, 0:wo_pad, :]                               # pair tap a=0
    xr1 = xrows[:, 1:1 + wo_pad, :]                           # pair tap a=1
    for j in range(tr):
        acc = None
        for di in range(3):
            r = 2 * j + di
            z = jnp.dot(xr0[r], w_ref[2 * di],
                        preferred_element_type=jnp.float32)
            acc = z if acc is None else acc + z
            acc = acc + jnp.dot(xr1[r], w_ref[2 * di + 1],
                                preferred_element_type=jnp.float32)
        o_ref[0, j, :, :] = jnp.maximum(acc + b_ref[...], 0.0).astype(o_ref.dtype)


def conv3x3_s2(x, w6, shift):
    """Stride-2 3x3 conv + BN shift + ReLU.

    x: (N,H,W,Cin) bf16 (H, W even); w6: (6, 2*Cin, Cout) bf16; shift: (Cout,) f32.
    """
    N, H, W, Cin = x.shape
    Cout = w6.shape[-1]
    assert H % 2 == 0 and W % 2 == 0
    assert w6.shape == (6, 2 * Cin, Cout)

    Hout, Wout = H // 2, W // 2
    tr = min(Hout, 14)                       # output rows per grid step
    hout_pad = _ceil_to(Hout, tr)
    wo_pad = _ceil_to(Wout, 8)
    wp2 = _ceil_to(wo_pad + 1, 8)            # padded pair pitch
    hp = 2 * hout_pad + 2                    # padded row count

    # Free reshape to the column-pair view, then one zero pad
    # (1 row top, rows to hp bottom, 1 pair left, pairs to wp2 right).
    x2 = x.reshape(N, H, W // 2, 2 * Cin)
    x2 = jnp.pad(x2, ((0, 0), (1, hp - H - 1), (1, wp2 - W // 2 - 1), (0, 0)))

    tc = Cout if Cout <= 256 else 256
    assert Cout % tc == 0
    shift2 = shift.reshape(1, Cout).astype(jnp.float32)

    kernel = functools.partial(_conv3x3_s2_kernel, tr=tr, wo_pad=wo_pad)
    out = pl.pallas_call(
        kernel,
        out_shape=jax.ShapeDtypeStruct((N, hout_pad, wo_pad, Cout), jnp.bfloat16),
        grid=(Cout // tc, N, hout_pad // tr),
        in_specs=[
            pl.BlockSpec((1, hp, wp2, 2 * Cin), lambda c, n, m: (n, 0, 0, 0)),
            pl.BlockSpec((6, 2 * Cin, tc), lambda c, n, m: (0, 0, c)),
            pl.BlockSpec((1, tc), lambda c, n, m: (0, c)),
        ],
        out_specs=pl.BlockSpec((1, tr, wo_pad, tc), lambda c, n, m: (n, m, 0, c)),
        compiler_params=pltpu.CompilerParams(
            dimension_semantics=("parallel", "parallel", "parallel"),
            vmem_limit_bytes=40 * 1024 * 1024,
        ),
    )(x2, w6, shift2)

    return out[:, :Hout, :Wout, :]


# ----------------------------------------------------------------------------
# Kernel 3: fused  (X @ W) + bias [+ ReLU]   (stem conv im2col + FC layers)
# ----------------------------------------------------------------------------
def _mm_bias_kernel(x_ref, w_ref, b_ref, o_ref, *, relu):
    acc = jnp.dot(x_ref[...], w_ref[...], preferred_element_type=jnp.float32)
    acc = acc + b_ref[...]
    if relu:
        acc = jnp.maximum(acc, 0.0)
    o_ref[...] = acc.astype(o_ref.dtype)


def matmul_bias(x, w, bias, relu, out_dtype):
    """x: (M,K) bf16, w: (K,N) bf16, bias: (N,) f32 -> (M,N) out_dtype."""
    M, K = x.shape
    K2, Nout = w.shape
    assert K == K2
    mpad = max(16, _ceil_to(M, 16))
    tm = min(2048, mpad)
    mpad = _ceil_to(mpad, tm)
    if mpad != M:
        x = jnp.pad(x, ((0, mpad - M), (0, 0)))   # padded rows sliced off below
    if Nout <= 2048:
        tn = Nout
    elif Nout % 2048 == 0:
        tn = 2048
    elif Nout % 1024 == 0:
        tn = 1024
    else:
        tn = Nout
    b2 = bias.reshape(1, Nout).astype(jnp.float32)

    kernel = functools.partial(_mm_bias_kernel, relu=relu)
    out = pl.pallas_call(
        kernel,
        out_shape=jax.ShapeDtypeStruct((mpad, Nout), out_dtype),
        grid=(mpad // tm, Nout // tn),
        in_specs=[
            pl.BlockSpec((tm, K), lambda i, j: (i, 0)),
            pl.BlockSpec((K, tn), lambda i, j: (0, j)),
            pl.BlockSpec((1, tn), lambda i, j: (0, j)),
        ],
        out_specs=pl.BlockSpec((tm, tn), lambda i, j: (i, j)),
        compiler_params=pltpu.CompilerParams(
            dimension_semantics=("parallel", "parallel"),
            vmem_limit_bytes=32 * 1024 * 1024,
        ),
    )(x, w, b2)
    return out[:M]


def conv11_stem(x, wmat, shift):
    """Stem conv (Cin=3, stride 1, pad 1) via cheap im2col glue + fused matmul."""
    N, H, W, Cin = x.shape
    xp = jnp.pad(x, ((0, 0), (1, 1), (1, 1), (0, 0)))
    cols = [xp[:, di:di + H, dj:dj + W, :] for di in range(3) for dj in range(3)]
    patches = jnp.stack(cols, axis=3).reshape(N * H * W, 9 * Cin)
    out = matmul_bias(patches, wmat, shift, relu=True, out_dtype=jnp.bfloat16)
    return out.reshape(N, H, W, -1)


# ----------------------------------------------------------------------------
# VGG16 parameters + forward
# ----------------------------------------------------------------------------
# (Cin, Cout, stride) for conv11..conv53 (stride-2 convs replace pooling)
VGG16_CFG = [
    (3, 64, 1), (64, 64, 2),
    (64, 128, 1), (128, 128, 2),
    (128, 256, 1), (256, 256, 1), (256, 256, 2),
    (256, 512, 1), (512, 512, 1), (512, 512, 2),
    (512, 512, 1), (512, 512, 1), (512, 512, 2),
]


def init_params(key, num_classes):
    params = {"convs": []}
    for (cin, cout, _s) in VGG16_CFG:
        key, kw = jax.random.split(key)
        std = (2.0 / (cout * 9.0)) ** 0.5        # kaiming_normal_(fan_out, relu)
        w = jax.random.normal(kw, (cout, cin, 3, 3), jnp.float32) * std
        params["convs"].append(dict(
            w=w,
            gamma=jnp.ones((cout,), jnp.float32),
            beta=jnp.zeros((cout,), jnp.float32),
            mean=jnp.zeros((cout,), jnp.float32),
            var=jnp.ones((cout,), jnp.float32),
        ))
    key, k1, k2, k3, k4 = jax.random.split(key, 5)
    b1 = 1.0 / (512.0 ** 0.5)
    params["fc1_w"] = jax.random.uniform(k1, (4096, 512), jnp.float32, -b1, b1)
    params["fc1_b"] = jax.random.uniform(k2, (4096,), jnp.float32, -b1, b1)
    b2 = 1.0 / (4096.0 ** 0.5)
    params["fc2_w"] = jax.random.uniform(k3, (num_classes, 4096), jnp.float32, -b2, b2)
    params["fc2_b"] = jax.random.uniform(k4, (num_classes,), jnp.float32, -b2, b2)
    return params


def prepare_params(params, eps=1e-5):
    """Fold BN (inference) into the weights, re-layout per kernel, cast to bf16."""
    fast = {"convs": []}
    for p, (cin, cout, stride) in zip(params["convs"], VGG16_CFG):
        scale = p["gamma"] / jnp.sqrt(p["var"] + eps)
        shift = p["beta"] - p["mean"] * scale
        whw = jnp.transpose(p["w"], (2, 3, 1, 0)) * scale[None, None, None, :]
        whw = whw.astype(jnp.bfloat16)           # (3, 3, Cin, Cout)
        if cin == 3:                             # stem: im2col matmul weight
            w = whw.reshape(9 * cin, cout)
        elif stride == 2:                        # stride-2 pair-tap weight
            zeros = jnp.zeros((cin, cout), jnp.bfloat16)
            taps = []
            for di in range(3):
                taps.append(jnp.concatenate([zeros, whw[di, 0]], axis=0))       # a=0
                taps.append(jnp.concatenate([whw[di, 1], whw[di, 2]], axis=0))  # a=1
            w = jnp.stack(taps, axis=0)          # (6, 2*Cin, Cout)
        elif cin <= 128:                         # stride-1, dj folded into K
            w = whw.reshape(3, 3 * cin, cout)
        else:                                    # stride-1, per-tap
            w = whw.reshape(9, cin, cout)
        fast["convs"].append(dict(w=w, shift=shift.astype(jnp.float32)))
    fast["fc1_w"] = jnp.transpose(params["fc1_w"]).astype(jnp.bfloat16)   # (512, 4096)
    fast["fc1_b"] = params["fc1_b"].astype(jnp.float32)
    fast["fc2_w"] = jnp.transpose(params["fc2_w"]).astype(jnp.bfloat16)   # (4096, nc)
    fast["fc2_b"] = params["fc2_b"].astype(jnp.float32)
    return fast


def vgg16_forward(x_nchw, fp, include_top=True):
    x = jnp.transpose(x_nchw, (0, 2, 3, 1)).astype(jnp.bfloat16)   # NCHW -> NHWC
    for layer, (cin, _cout, stride) in zip(fp["convs"], VGG16_CFG):
        if cin == 3:
            x = conv11_stem(x, layer["w"], layer["shift"])
        elif stride == 2:
            x = conv3x3_s2(x, layer["w"], layer["shift"])
        else:
            x = conv3x3_s1(x, layer["w"], layer["shift"])
    if not include_top:
        return jnp.transpose(x, (0, 3, 1, 2)).astype(jnp.float32)
    # AvgPool2d(7) (stride 7) + flatten; final map is 7x7 for 224x224 inputs.
    N, H, W, C = x.shape
    hf, wf = H // 7, W // 7
    x = x[:, :hf * 7, :wf * 7, :].reshape(N, hf, 7, wf, 7, C)
    x = jnp.mean(x.astype(jnp.float32), axis=(2, 4)).reshape(N, hf * wf * C)
    x = x.astype(jnp.bfloat16)
    x = matmul_bias(x, fp["fc1_w"], fp["fc1_b"], relu=False, out_dtype=jnp.bfloat16)
    x = matmul_bias(x, fp["fc2_w"], fp["fc2_b"], relu=False, out_dtype=jnp.float32)
    return x


# ----------------------------------------------------------------------------
# small correctness self-check of both fused conv kernels vs lax.conv
# ----------------------------------------------------------------------------
def _self_test():
    key = jax.random.PRNGKey(42)
    k1, k2, k3 = jax.random.split(key, 3)
    N, H, W, Cin, Cout = 2, 12, 12, 16, 32
    x = jax.random.normal(k1, (N, H, W, Cin), jnp.float32).astype(jnp.bfloat16)
    w_hwio = jax.random.normal(k2, (3, 3, Cin, Cout), jnp.float32) * 0.08
    shift = jax.random.normal(k3, (Cout,), jnp.float32) * 0.1
    wb = w_hwio.astype(jnp.bfloat16)
    w_ref = wb.astype(jnp.float32)

    def ref(stride):
        r = jax.lax.conv_general_dilated(
            x.astype(jnp.float32), w_ref, (stride, stride), ((1, 1), (1, 1)),
            dimension_numbers=("NHWC", "HWIO", "NHWC"))
        return jnp.maximum(r + shift[None, None, None, :], 0.0)

    # stride 1, dj-folded weights (K = 3*Cin)
    got = conv3x3_s1(x, wb.reshape(3, 3 * Cin, Cout), shift).astype(jnp.float32)
    assert bool(jnp.allclose(got, ref(1), rtol=5e-2, atol=5e-2)), "s1/fold failed"
    # stride 1, per-tap weights
    got = conv3x3_s1(x, wb.reshape(9, Cin, Cout), shift).astype(jnp.float32)
    assert bool(jnp.allclose(got, ref(1), rtol=5e-2, atol=5e-2)), "s1 failed"
    # stride 2, pair-tap weights
    zeros = jnp.zeros((Cin, Cout), jnp.bfloat16)
    taps = []
    for di in range(3):
        taps.append(jnp.concatenate([zeros, wb[di, 0]], axis=0))
        taps.append(jnp.concatenate([wb[di, 1], wb[di, 2]], axis=0))
    w6 = jnp.stack(taps, axis=0)
    got = conv3x3_s2(x, w6, shift).astype(jnp.float32)
    r2 = ref(2)
    assert got.shape == r2.shape, (got.shape, r2.shape)
    assert bool(jnp.allclose(got, r2, rtol=5e-2, atol=5e-2)), "s2 failed"


if __name__ == "__main__":
    _self_test()

    key = jax.random.PRNGKey(0)
    key, kx = jax.random.split(key)
    num_classes = 10
    # AvgPool2d(7) + Linear(512, 4096) imply ImageNet-style 224x224 inputs.
    x = jax.random.normal(kx, (2, 3, 224, 224), jnp.float32)
    params = init_params(key, num_classes)
    fast = prepare_params(params)

    fwd = jax.jit(functools.partial(vgg16_forward, include_top=True))
    out = jax.block_until_ready(fwd(x, fast))
    assert out.shape == (2, num_classes), out.shape
    assert out.dtype == jnp.float32
    assert bool(jnp.all(jnp.isfinite(out)))
    print("KERNEL_OK")
</pallas_src>

<mosaic_0001>
module attributes {stable_mosaic.version = 11 : i64} {
  func.func @_conv3x3_s1_kernel(%arg0: i32, %arg1: i32, %arg2: i32, %arg3: memref<1x240x16xbf16, #tpu.memory_space<vmem>>, %arg4: memref<3x48x32xbf16, #tpu.memory_space<vmem>>, %arg5: memref<1x32xf32, #tpu.memory_space<vmem>>, %arg6: memref<1x192x32xbf16, #tpu.memory_space<vmem>>) attributes {dimension_semantics = [#tpu.dimension_semantics<parallel>, #tpu.dimension_semantics<parallel>, #tpu.dimension_semantics<parallel>], iteration_bounds = array<i64: 1, 2, 1>, scalar_prefetch = 0 : i64, scratch_operands = 0 : i64, tpu.core_type = #tpu.core_type<tc>, window_params = [{transform_indices = @transform_0, window_bounds = array<i64: 1, 240, 16>}, {transform_indices = @transform_1, window_bounds = array<i64: 3, 48, 32>}, {transform_indices = @transform_2, window_bounds = array<i64: 1, 32>}, {transform_indices = @transform_3, window_bounds = array<i64: 1, 192, 32>}]} {
    %c192_i32 = arith.constant 192 : i32
    %0 = arith.muli %arg2, %c192_i32 : i32
    %1 = tpu.assume_multiple %0, 16 : i32
    %c0 = arith.constant 0 : index
    %2 = arith.index_cast %1 : i32 to index
    %c0_0 = arith.constant 0 : index
    %3 = vector.load %arg3[%c0, %2, %c0_0] : memref<1x240x16xbf16, #tpu.memory_space<vmem>>, vector<1x240x16xbf16>
    %4 = vector.shape_cast %3 : vector<1x240x16xbf16> to vector<240x16xbf16>
    %5 = vector.extract_strided_slice %4 {offsets = [0, 0], sizes = [192, 16], strides = [1, 1]} : vector<240x16xbf16> to vector<192x16xbf16>
    %6 = vector.extract_strided_slice %4 {offsets = [1, 0], sizes = [192, 16], strides = [1, 1]} : vector<240x16xbf16> to vector<192x16xbf16>
    %7 = vector.extract_strided_slice %4 {offsets = [2, 0], sizes = [192, 16], strides = [1, 1]} : vector<240x16xbf16> to vector<192x16xbf16>
    %8 = tpu.concatenate %5, %6, %7 in 1 : vector<192x16xbf16>, vector<192x16xbf16>, vector<192x16xbf16> -> vector<192x48xbf16>
    %c0_1 = arith.constant 0 : index
    %c0_2 = arith.constant 0 : index
    %c0_3 = arith.constant 0 : index
    %9 = vector.load %arg4[%c0_1, %c0_2, %c0_3] : memref<3x48x32xbf16, #tpu.memory_space<vmem>>, vector<1x48x32xbf16>
    %10 = vector.shape_cast %9 : vector<1x48x32xbf16> to vector<48x32xbf16>
    %cst = arith.constant dense<0.000000e+00> : vector<192x32xf32>
    %11 = tpu.matmul %8, %10, %cst {dimension_numbers = #tpu.dot_dimension_numbers<[1], [0], [0], [1], [0, 0, 1, 1], [], []>} : vector<192x48xbf16>, vector<48x32xbf16>, vector<192x32xf32> -> vector<192x32xf32>
    %12 = vector.extract_strided_slice %4 {offsets = [16, 0], sizes = [192, 16], strides = [1, 1]} : vector<240x16xbf16> to vector<192x16xbf16>
    %13 = vector.extract_strided_slice %4 {offsets = [17, 0], sizes = [192, 16], strides = [1, 1]} : vector<240x16xbf16> to vector<192x16xbf16>
    %14 = vector.extract_strided_slice %4 {offsets = [18, 0], sizes = [192, 16], strides = [1, 1]} : vector<240x16xbf16> to vector<192x16xbf16>
    %15 = tpu.concatenate %12, %13, %14 in 1 : vector<192x16xbf16>, vector<192x16xbf16>, vector<192x16xbf16> -> vector<192x48xbf16>
    %c1 = arith.constant 1 : index
    %c0_4 = arith.constant 0 : index
    %c0_5 = arith.constant 0 : index
    %16 = vector.load %arg4[%c1, %c0_4, %c0_5] : memref<3x48x32xbf16, #tpu.memory_space<vmem>>, vector<1x48x32xbf16>
    %17 = vector.shape_cast %16 : vector<1x48x32xbf16> to vector<48x32xbf16>
    %cst_6 = arith.constant dense<0.000000e+00> : vector<192x32xf32>
    %18 = tpu.matmul %15, %17, %cst_6 {dimension_numbers = #tpu.dot_dimension_numbers<[1], [0], [0], [1], [0, 0, 1, 1], [], []>} : vector<192x48xbf16>, vector<48x32xbf16>, vector<192x32xf32> -> vector<192x32xf32>
    %19 = arith.addf %11, %18 : vector<192x32xf32>
    %20 = vector.extract_strided_slice %4 {offsets = [32, 0], sizes = [192, 16], strides = [1, 1]} : vector<240x16xbf16> to vector<192x16xbf16>
    %21 = vector.extract_strided_slice %4 {offsets = [33, 0], sizes = [192, 16], strides = [1, 1]} : vector<240x16xbf16> to vector<192x16xbf16>
    %22 = vector.extract_strided_slice %4 {offsets = [34, 0], sizes = [192, 16], strides = [1, 1]} : vector<240x16xbf16> to vector<192x16xbf16>
    %23 = tpu.concatenate %20, %21, %22 in 1 : vector<192x16xbf16>, vector<192x16xbf16>, vector<192x16xbf16> -> vector<192x48xbf16>
    %c2 = arith.constant 2 : index
    %c0_7 = arith.constant 0 : index
    %c0_8 = arith.constant 0 : index
    %24 = vector.load %arg4[%c2, %c0_7, %c0_8] : memref<3x48x32xbf16, #tpu.memory_space<vmem>>, vector<1x48x32xbf16>
    %25 = vector.shape_cast %24 : vector<1x48x32xbf16> to vector<48x32xbf16>
    %cst_9 = arith.constant dense<0.000000e+00> : vector<192x32xf32>
    %26 = tpu.matmul %23, %25, %cst_9 {dimension_numbers = #tpu.dot_dimension_numbers<[1], [0], [0], [1], [0, 0, 1, 1], [], []>} : vector<192x48xbf16>, vector<48x32xbf16>, vector<192x32xf32> -> vector<192x32xf32>
    %27 = arith.addf %19, %26 : vector<192x32xf32>
    %c0_10 = arith.constant 0 : index
    %c0_11 = arith.constant 0 : index
    %28 = vector.load %arg5[%c0_10, %c0_11] : memref<1x32xf32, #tpu.memory_space<vmem>>, vector<1x32xf32>
    %29 = vector.broadcast %28 : vector<1x32xf32> to vector<192x32xf32>
    %30 = arith.addf %27, %29 : vector<192x32xf32>
    %cst_12 = arith.constant 0.000000e+00 : f32
    %31 = vector.broadcast %cst_12 : f32 to vector<192x32xf32>
    %32 = arith.maximumf %30, %31 : vector<192x32xf32>
    %33 = arith.truncf %32 : vector<192x32xf32> to vector<192x32xbf16>
    %c0_13 = arith.constant 0 : index
    %c0_14 = arith.constant 0 : index
    %c0_15 = arith.constant 0 : index
    %34 = vector.load %arg6[%c0_13, %c0_14, %c0_15] : memref<1x192x32xbf16, #tpu.memory_space<vmem>>, vector<1x192x32xbf16>
    %35 = vector.shape_cast %34 : vector<1x192x32xbf16> to vector<192x32xbf16>
    %36 = vector.shape_cast %33 : vector<192x32xbf16> to vector<1x192x32xbf16>
    tpu.vector_store %arg6[%c0_13, %c0_14, %c0_15], %36 {strides = array<i32>} : memref<1x192x32xbf16, #tpu.memory_space<vmem>>, vector<1x192x32xbf16>,
    return
  }
  func.func @transform_0(%arg0: i32, %arg1: i32, %arg2: i32) -> (i32, i32, i32) {
    %c0_i32 = arith.constant 0 : i32
    %c0_i32_0 = arith.constant 0 : i32
    %c0_i32_1 = arith.constant 0 : i32
    return %arg1, %c0_i32, %c0_i32_0 : i32, i32, i32
  }
  func.func @transform_1(%arg0: i32, %arg1: i32, %arg2: i32) -> (i32, i32, i32) {
    %c0_i32 = arith.constant 0 : i32
    %c0_i32_0 = arith.constant 0 : i32
    %c0_i32_1 = arith.constant 0 : i32
    return %c0_i32, %c0_i32_0, %arg0 : i32, i32, i32
  }
  func.func @transform_2(%arg0: i32, %arg1: i32, %arg2: i32) -> (i32, i32) {
    %c0_i32 = arith.constant 0 : i32
    %c0_i32_0 = arith.constant 0 : i32
    return %c0_i32, %arg0 : i32, i32
  }
  func.func @transform_3(%arg0: i32, %arg1: i32, %arg2: i32) -> (i32, i32, i32) {
    %c0_i32 = arith.constant 0 : i32
    return %arg1, %arg2, %arg0 : i32, i32, i32
  }
}

</mosaic_0001>

<bundles_post_ra>
// kernel: tpu_custom_call.1
= control target key start
LH: loop header
LB: loop body
LE: loop exit
PB: predicated region body
PF: predicated region fallthrough
CT: control target
= control target key end

     0   :  { %s1833_s12 = smov 0   ;;  %s1835_s13 = smov 0   ;;  %s2329_s0 = inlined_call_operand.vmem [shape: bf16[2,240,16], index: 0, kind: input, shape index: {}]   ;;  %s2330_s1 = inlined_call_operand.vmem [shape: bf16[3,48,32], index: 1, kind: input, shape index: {}]   ;;  %s2331_s2 = inlined_call_operand.vmem [shape: f32[1,32], index: 2, kind: input, shape index: {}]   ;;  %s2332_s3 = inlined_call_operand.vmem [shape: bf16[2,192,32], index: 3, kind: output, shape index: {}]  }
   0x1   :  { %s1837_s14 = smov 0  }
   0x2 LB: > { %s28_s15 = sadd.s32 1, %s1805_s13  ;;  %p1464_p0 = scmp.ge.s32.totalorder %s1809_s14, 1  ;;  %s1809_s14 = sphi %s1837_s14, %s13_s14   ;;  %s1805_s13 = sphi %s1835_s13, %s2334_s13   ;;  %s1801_s12 = sphi %s1833_s12, %s2333_s12  }
   0x3   : > { %p30_p1 = scmp.ge.s32.totalorder %s28_s15, 2  ;;  %p177_p2 = scmp.lt.s32.totalorder %s1809_s14, 3 }
   0x5   : > { %s2336_s15 = smov (%p30_p1, %s28_s15), 0  ;;  %p178_p3 = pnand %p1464_p0, %p177_p2 }
   0x6   : > { %p215_p4 = scmp.lt.s32.totalorder (!%p178_p3), %s1801_s12, 1  ;;  %s1811_s24 = smov (!%p178_p3), 32  }
   0x7   : > { %181 = sbr.rel (%p178_p3) target bundleno = 437 (0x1b5), region = 32  ;;  %s1812_s25 = smov (!%p178_p3), 16  }
   0xc   : > { %v1778_v0 = vld [vmem:[%s2330_s1 + $0x28] sm:$0xff]   ;;  %s2338_s12 = smov (!%p215_p4, %s1801_s12), 1  ;;  %vm463_vm0 = vcmask 1046528   ;;  %v1779_v1 = vld [vmem:[%s2330_s1 + $0x20] sm:$0xff]   ;;  %vm338_vm1 = vsmask.f32 7424 }
   0xd   : > { %1637 = vmatprep.subr.bf16.mxu0 %v1778_v0  ;;  %1727 = vmatprep.subr.bf16.mxu1 %v1778_v0  ;;  %s1733_s18 = smul.u32 120, %s2338_s12  ;;  %v1780_v52 = vld [vmem:[%s2330_s1 + $0x18] sm:$0xff]   ;;  %vm513_vm2 = vcmask 130048   ;;  %vm538_vm3 = vcmask 261120   ;;  %vm633_vm4 = vcmask 392192   ;;  %vm1310_vm5 = vcmask 257024  }
   0xe   : > { %1638 = vmatpush3.bf16.msra.mxu0 %v1778_v0  ;;  %1730 = vmatpush3.bf16.msra.mxu1 %v1778_v0  ;;  %v1960_v0 = vld [vmem:[%s2330_s1 + $0x10] sm:$0xff]   ;;  %s1734_s19 = smul.u32 96, %s2338_s12 }
   0xf   : > { %s1863_s23 = scalar_lea.vmem %s2329_s0, %s1733_s18  ;;  %1639 = vmatprep.subr.bf16.mxu0 %v1779_v1  ;;  %1728 = vmatprep.subr.bf16.mxu1 %v1779_v1 }
  0x10   : > { %v1866_v2 = vld [vmem:[%s1863_s23 + $0x40] sm:$0xff]   ;;  %v1869_v3 = vld [vmem:[%s1863_s23 + $0x48] sm:$0xff]   ;;  %v1872_v4 = vld [vmem:[%s1863_s23 + $0x38] sm:$0xff]   ;;  %s2233_s22 = scalar_lea.vmem %s2332_s3, %s1734_s19 }
  0x11   : > { %v479_v5 = vrot.slane %v1866_v2, 1  ;;  %v481_v6 = vrot.slane %v1869_v3, 1  ;;  %v477_v7 = vrot.slane %v1872_v4, 1  ;;  %v1878_v8 = vld [vmem:[%s1863_s23 + $0x10] sm:$0xff]   ;;  %v1884_v10 = vld [vmem:[%s1863_s23 + $0x18] sm:$0xff]   ;;  %v395_v11 = vshll.u32 %v1872_v4, 16 }
  0x12   : > { %1640 = vmatpush3.bf16.msra.mxu0 %v1779_v1  ;;  %1731 = vmatpush3.bf16.msra.mxu1 %v1779_v1  ;;  %v467_v13 = vrot.slane %v1878_v8, 1  ;;  %v1893_v14 = vld [vmem:[%s1863_s23 + $0x8] sm:$0xff]   ;;  %v399_v15 = vshrl.u32 %v1872_v4, 16  ;;  %v403_v16 = vshll.u32 %v1866_v2, 16  ;;  %v469_v17 = vrot.slane %v1884_v10, 1  ;;  %v1907_v25 = vld [vmem:[%s1863_s23 + $0x50] sm:$0xff]  }
  0x13   : > { %v482_v9 = vsel %vm463_vm0, %v479_v5, %v481_v6  ;;  %v480_v12 = vsel %vm463_vm0, %v477_v7, %v479_v5  ;;  %v1899_v18 = vrot.slane %v395_v11, 1  ;;  %v355_v19 = vshll.u32 %v1878_v8, 16  ;;  %v1910_v26 = vld [vmem:[%s1863_s23 + $0x58] sm:$0xff]   ;;  %v1929_v39 = vld [vmem:[%s1863_s23 + $0x20] sm:$0xff]   ;;  %v1941_v51 = vld [vmem:[%s1863_s23 + $0x28] sm:$0xff]   ;;  %1641 = vmatprep.subr.bf16.mxu0 %v1780_v52  ;;  %1729 = vmatprep.subr.bf16.mxu1 %v1780_v52 }
  0x14   : > { %505 = vrot.lane.b32.xlu0 %v482_v9, %s1811_s24  ;;  %503 = vrot.lane.b32.xlu1 %v480_v12, %s1811_s24  ;;  %v407_v20 = vshrl.u32 %v1866_v2, 16  ;;  %v465_v21 = vrot.slane %v1893_v14, 1  ;;  %v405_v22 = vrot.slane %v403_v16, 1  ;;  %v347_v23 = vshll.u32 %v1893_v14, 16  ;;  %v1949_v57 = vld [vmem:[%s1863_s23 + $0x60] sm:$0xf] }
  0x15   : > { %v351_v24 = vshrl.u32 %v1893_v14, 16  ;;  %v470_v27 = vsel %vm463_vm0, %v467_v13, %v469_v17  ;;  %v401_v28 = vor.u32 %v399_v15, %v1899_v18  ;;  %v357_v29 = vrot.slane %v355_v19, 1  ;;  %v271_v58 = vld [vmem:[%s1863_s23 + $0x64] sm:$0xf]  ;;  %v272_v11 = vld [vmem:[%s1863_s23 + $0x68] sm:$0xf] }
  0x16   : > { %v411_v30 = vshll.u32 %v1869_v3, 16  ;;  %v468_v31 = vsel %vm463_vm0, %v465_v21, %v467_v13  ;;  %v1920_v32 = vrot.slane %v347_v23, 1  ;;  %v409_v33 = vor.u32 %v407_v20, %v405_v22  ;;  %1642 = vmatpush3.bf16.msra.mxu0 %v1780_v52  ;;  %1732 = vmatpush3.bf16.msra.mxu1 %v1780_v52  ;;  %v1981_v16 = vld [vmem:[%s2330_s1 + $0x40] sm:$0xff]  }
  0x17   : > { %v359_v34 = vshrl.u32 %v1878_v8, 16  ;;  %v406_v35 = vsel %vm338_vm1, %v401_v28, %v405_v22  ;;  %v363_v37 = vshll.u32 %v1884_v10, 16  ;;  %v415_v38 = vshrl.u32 %v1869_v3, 16  ;;  %1667 = vmatprep.subr.bf16.mxu1 %v1960_v0  ;;  %1697 = vmatprep.subr.bf16.mxu0 %v1981_v16 }
  0x18   : > { %493 = vrot.lane.b32.xlu1 %v470_v27, %s1811_s24  ;;  %491 = vrot.lane.b32.xlu0 %v468_v31, %s1811_s24  ;;  %v413_v36 = vrot.slane %v411_v30, 1  ;;  %v353_v40 = vor.u32 %v351_v24, %v1920_v32  ;;  %v419_v42 = vshll.u32 %v1907_v25, 16  ;;  %v423_v43 = vshrl.u32 %v1907_v25, 16 }
  0x19   : > { %v361_v41 = vor.u32 %v359_v34, %v357_v29  ;;  %v365_v44 = vrot.slane %v363_v37, 1  ;;  %v427_v45 = vshll.u32 %v1910_v26, 16  ;;  %v367_v49 = vshrl.u32 %v1884_v10, 16  ;;  %v1995_v34 = vld [vmem:[%s1863_s23 + $0x30] sm:$0xff]  }
  0x1a   : > { %v358_v46 = vsel %vm338_vm1, %v353_v40, %v357_v29  ;;  %v421_v47 = vrot.slane %v419_v42, 1  ;;  %v371_v50 = vshll.u32 %v1929_v39, 16  ;;  %v414_v53 = vsel %vm338_vm1, %v409_v33, %v413_v36 }
  0x1b   : > { %v429_v48 = vrot.slane %v427_v45, 1  ;;  %v366_v54 = vsel %vm338_vm1, %v361_v41, %v365_v44  ;;  %v417_v55 = vor.u32 %v415_v38, %v413_v36  ;;  %v483_v59 = vrot.slane %v1907_v25, 1 }
  0x1c   : > { %453 = vrot.lane.b32.xlu0 %v406_v35, %s1812_s25  ;;  %441 = vrot.lane.b32.xlu1 %v358_v46, %s1812_s25  ;;  %v425_v56 = vor.u32 %v423_v43, %v421_v47  ;;  %v369_v60 = vor.u32 %v367_v49, %v365_v44  ;;  %v373_v61 = vrot.slane %v371_v50, 1  ;;  %v375_v62 = vshrl.u32 %v1929_v39, 16  ;;  %v273_v50 = vld [vmem:[%s1863_s23 + $0x6c] sm:$0xf] }
  0x1d   : > { %v379_v63 = vshll.u32 %v1941_v51, 16  ;;  %v422_v1 = vsel %vm338_vm1, %v417_v55, %v421_v47  ;;  %v1965_v9 = vcombine.low %v1949_v57, %v271_v58  ;;  %v484_v12 = vsel %vm463_vm0, %v481_v6, %v483_v59 }
  0x1e   : > { %v430_v5 = vsel %vm338_vm1, %v425_v56, %v429_v48  ;;  %v374_v13 = vsel %vm338_vm1, %v369_v60, %v373_v61  ;;  %v1976_v15 = vrot.slane %v1910_v26, 1  ;;  %v377_v19 = vor.u32 %v375_v62, %v373_v61 }
  0x1f   : > { %v381_v20 = vrot.slane %v379_v63, 1  ;;  %v576_v22 = vshll.u32 %v1965_v9, 16  ;;  %v1481_v23 = vcombine.low %v272_v11, %v272_v11  ;;  %v471_v24 = vrot.slane %v1929_v39, 1 }
  0x20   : > { %455 = vrot.lane.b32.xlu0 %v414_v53, %s1812_s25  ;;  %443 = vrot.lane.b32.xlu1 %v366_v54, %s1812_s25  ;;  %v486_v6 = vsel %vm463_vm0, %v483_v59, %v1976_v15  ;;  %v473_v27 = vrot.slane %v1941_v51, 1  ;;  %v431_v28 = vshrl.u32 %v1910_v26, 16  ;;  %v580_v31 = vshrl.u32 %v1965_v9, 16 }
  0x21   : > { %v382_v29 = vsel %vm338_vm1, %v377_v19, %v381_v20  ;;  %v578_v30 = vrot.slane %v576_v22, 1  ;;  %v584_v33 = vshll.u32 %v1481_v23, 16  ;;  %v472_v35 = vsel %vm463_vm0, %v469_v17, %v471_v24 }
  0x22   : > { %v474_v36 = vsel %vm463_vm0, %v471_v24, %v473_v27  ;;  %v433_v37 = vor.u32 %v431_v28, %v429_v48  ;;  %v383_v41 = vshrl.u32 %v1941_v51, 16  ;;  %v387_v42 = vshll.u32 %v1995_v34, 16  ;;  %v2012_v48 = vld [vmem:[%s1863_s23] sm:$0xff]  }
  0x23   : > { %v582_v38 = vor.u32 %v580_v31, %v578_v30  ;;  %v586_v40 = vrot.slane %v584_v33, 1  ;;  %v592_v43 = vrot.slane %v1965_v9, 1  ;;  %v391_v44 = vshrl.u32 %v1995_v34, 16 }
  0x24   : > { %457 = vrot.lane.b32.xlu0 %v422_v1, %s1812_s25  ;;  %459 = vrot.lane.b32.xlu1 %v430_v5, %s1812_s25  ;;  %v579_v17 = vsel %vm338_vm1, %v433_v37, %v578_v30  ;;  %v385_v46 = vor.u32 %v383_v41, %v381_v20  ;;  %v389_v47 = vrot.slane %v387_v42, 1  ;;  %v594_v49 = vrot.slane %v1481_v23, 1 }
  0x25   : > { %v587_v45 = vsel %vm338_vm1, %v582_v38, %v586_v40  ;;  %v593_v52 = vsel %vm463_vm0, %v1976_v15, %v592_v43  ;;  %v342_v55 = vshll.u32 %v2012_v48, 16  ;;  %v2021_v56 = vcombine.low %v272_v11, %v273_v50  ;;  %v1777_v11 = vld [vmem:[%s1863_s23 + $0x70] ss:$0 sps:$4 sm:$0xff]   ;;  %v1784_v50 = vld [vmem:[%s2330_s1 + $0x38] sm:$0xff]  }
  0x26   : > { %v390_v53 = vsel %vm338_vm1, %v385_v46, %v389_v47  ;;  %v393_v54 = vor.u32 %v391_v44, %v389_v47  ;;  %v595_v58 = vsel %vm463_vm0, %v592_v43, %v594_v49  ;;  %v475_v59 = vrot.slane %v1995_v34, 1  ;;  %v1783_v49 = vld [vmem:[%s2330_s1 + $0x8] sm:$0xff]  }
  0x27   : > { %v340_v61 = vshrl.u32 %v2012_v48, 16  ;;  %v344_v62 = vrot.slane %v342_v55, 1  ;;  %v1479_v63 = vcombine.low %v1949_v57, %v1949_v57  ;;  %v464_v5 = vrot.slane %v2012_v48, 1  ;;  %v1786_v55 = vld [vmem:[%s2330_s1 + $0x30] sm:$0xff]  }
  0x28   : > { %507 = vrot.lane.b32.xlu0 %v484_v12, %s1811_s24  ;;  %445 = vrot.lane.b32.xlu1 %v374_v13, %s1812_s25  ;;  %v398_v60 = vsel %vm338_vm1, %v393_v54, %v1899_v18  ;;  %v476_v1 = vsel %vm463_vm0, %v473_v27, %v475_v59  ;;  %v478_v12 = vsel %vm463_vm0, %v475_v59, %v477_v7  ;;  %v945_v19 = vshll.u32 %v2021_v56, 16  ;;  %v1785_v54 = vld [vmem:[%s2330_s1] sm:$0xff]  }
  0x29   : > { %v345_v18 = vor.u32 %v344_v62, %v340_v61  ;;  %v435_v13 = vshll.u32 %v1479_v63, 16  ;;  %v466_v57 = vsel %vm463_vm0, %v464_v5, %v465_v21  ;;  %v949_v20 = vshrl.u32 %v2021_v56, 16 }
  0x2a   : > { %v953_v22 = vshll.u32 %v1777_v11, 16  ;;  %v487_v7 = vrot.slane %v1479_v63, 1  ;;  %v947_v24 = vrot.slane %v945_v19, 1  ;;  %v961_v31 = vrot.slane %v2021_v56, 1 }
  0x2b   : > { %v350_v23 = vsel %vm338_vm1, %v345_v18, %v1920_v32  ;;  %v963_v33 = vrot.slane %v1777_v11, 1 }
  0x2c   : > { %509 = vrot.lane.b32.xlu0 %v486_v6, %s1811_s24  ;;  %447 = vrot.lane.b32.xlu1 %v382_v29, %s1812_s25  ;;  %v437_v6 = vrot.slane %v435_v13, 1  ;;  %v488_v28 = vsel %vm463_vm0, %v1976_v15, %v487_v7  ;;  %v951_v29 = vor.u32 %v949_v20, %v947_v24  ;;  %v955_v21 = vrot.slane %v953_v22, 1 }
  0x2d   : > { %v948_v32 = vsel %vm338_vm1, %v582_v38, %v947_v24  ;;  %v964_v15 = vsel %vm463_vm0, %v961_v31, %v963_v33 }
  0x2e   : > { %v438_v27 = vsel %vm338_vm1, %v433_v37, %v437_v6  ;;  %v956_v30 = vsel %vm338_vm1, %v951_v29, %v955_v21 }
  0x30   : > { %495 = vrot.lane.b32.xlu0 %v472_v35, %s1811_s24  ;;  %497 = vrot.lane.b32.xlu1 %v474_v36, %s1811_s24  ;;  %v962_v35 = vsel %vm463_vm0, %v592_v43, %v961_v31 }
  0x34   : > { %588 = vrot.lane.b32.xlu0 %v579_v17, %s1812_s25  ;;  %590 = vrot.lane.b32.xlu1 %v587_v45, %s1812_s25 }
  0x38   : > { %596 = vrot.lane.b32.xlu0 %v593_v52, %s1811_s24  ;;  %449 = vrot.lane.b32.xlu1 %v390_v53, %s1812_s25 }
  0x3c   : > { %598 = vrot.lane.b32.xlu0 %v595_v58, %s1811_s24  ;;  %451 = vrot.lane.b32.xlu1 %v398_v60, %s1812_s25 }
  0x40   : > { %499 = vrot.lane.b32.xlu0 %v476_v1, %s1811_s24  ;;  %501 = vrot.lane.b32.xlu1 %v478_v12, %s1811_s24 }
  0x44   : > { %439 = vrot.lane.b32.xlu0 %v350_v23, %s1812_s25  ;;  %489 = vrot.lane.b32.xlu1 %v466_v57, %s1811_s24 }
  0x48   : > { %461 = vrot.lane.b32.xlu0 %v438_v27, %s1812_s25  ;;  %511 = vrot.lane.b32.xlu1 %v488_v28, %s1811_s24 }
  0x4c   : > { %957 = vrot.lane.b32.xlu0 %v948_v32, %s1812_s25  ;;  %959 = vrot.lane.b32.xlu1 %v956_v30, %s1812_s25 }
  0x50   : > { %965 = vrot.lane.b32.xlu0 %v962_v35, %s1811_s24  ;;  %967 = vrot.lane.b32.xlu1 %v964_v15, %s1811_s24 }
  0x86   : > { %v506_v36 = vpop.permute.xlu0 %505  ;;  %v504_v37 = vpop.permute.xlu1 %503 }
  0x8a   : > { %v494_v38 = vpop.permute.xlu1 %493  ;;  %v492_v40 = vpop.permute.xlu0 %491 }
  0x8e   : > { %v454_v41 = vpop.permute.xlu0 %453  ;;  %v442_v42 = vpop.permute.xlu1 %441 }
  0x8f   : > { %v529_v44 = vsel %vm513_vm2, %v1872_v4, %v454_v41  ;;  %v517_v43 = vsel %vm513_vm2, %v1893_v14, %v442_v42 }
  0x90   : > { %v2070_v17 = vsel %vm538_vm3, %v517_v43, %v492_v40  ;;  %v2073_v45 = vsel %vm538_vm3, %v529_v44, %v504_v37 }
  0x91   : > { %1643 = vmatprep.mubr.msk.bf16.mxu0 %vm633_vm4, %v2070_v17  ;;  %1655 = vmatprep.mubr.msk.bf16.mxu1 %vm633_vm4, %v2073_v45 }
  0x92   : > { %v456_v46 = vpop.permute.xlu0 %455  ;;  %v444_v47 = vpop.permute.xlu1 %443 }
  0x93   : > { %v531_v4 = vsel %vm513_vm2, %v1866_v2, %v456_v46  ;;  %v519_v14 = vsel %vm513_vm2, %v1878_v8, %v444_v47 }
  0x94   : > { %v2090_v52 = vsel %vm538_vm3, %v519_v14, %v494_v38  ;;  %v2093_v53 = vsel %vm538_vm3, %v531_v4, %v506_v36 }
  0x95   : > { %1644 = vmatmul.mubr.msk.bf16.vlgmr.msra.gmra.mxu0 %vm633_vm4, %v2090_v52  ;;  %1656 = vmatmul.mubr.msk.bf16.vlgmr.msra.gmra.mxu1 %vm633_vm4, %v2093_v53 }
  0x96   : > { %v458_v2 = vpop.permute.xlu0 %457  ;;  %v460_v8 = vpop.permute.xlu1 %459  ;;  %1668 = vmatpush3.bf16.msra.mxu1 %v1960_v0  ;;  %1698 = vmatpush3.bf16.msra.mxu0 %v1981_v16 }
  0x97   : > { %1669 = vmatprep.subr.bf16.mxu1 %v1783_v49  ;;  %1699 = vmatprep.subr.bf16.mxu0 %v1784_v50  ;;  %v533_v58 = vsel %vm513_vm2, %v1869_v3, %v458_v2  ;;  %v535_v16 = vsel %vm513_vm2, %v1907_v25, %v460_v8 }
  0x9a   : > { %v508_v59 = vpop.permute.xlu0 %507  ;;  %v446_v60 = vpop.permute.xlu1 %445  ;;  %1670 = vmatpush3.bf16.msra.mxu1 %v1783_v49  ;;  %1700 = vmatpush3.bf16.msra.mxu0 %v1784_v50 }
  0x9b   : > { %v2110_v0 = vsel %vm538_vm3, %v533_v58, %v508_v59  ;;  %1671 = vmatprep.subr.bf16.mxu1 %v1785_v54  ;;  %1701 = vmatprep.subr.bf16.mxu0 %v1786_v55  ;;  %v521_v63 = vsel %vm513_vm2, %v1884_v10, %v446_v60 }
  0x9c   : > { %1659 = vmatprep.mubr.msk.bf16.mxu1 %vm633_vm4, %v2110_v0 }
  0x9e   : > { %v510_v61 = vpop.permute.xlu0 %509  ;;  %v448_v62 = vpop.permute.xlu1 %447  ;;  %1672 = vmatpush3.bf16.msra.mxu1 %v1785_v54  ;;  %1702 = vmatpush3.bf16.msra.mxu0 %v1786_v55 }
  0x9f   : > { %v2117_v3 = vsel %vm538_vm3, %v535_v16, %v510_v61  ;;  %v523_v1 = vsel %vm513_vm2, %v1929_v39, %v448_v62 }
  0xa0   : > { %1660 = vmatmul.mubr.msk.bf16.gmra.mxu1 %vm633_vm4, %v2117_v3 }
  0xa2   : > { %v496_v5 = vpop.permute.xlu0 %495  ;;  %v498_v11 = vpop.permute.xlu1 %497 }
  0xa3   : > { %v546_v25 = vsel %vm538_vm3, %v521_v63, %v496_v5  ;;  %v548_v12 = vsel %vm538_vm3, %v523_v1, %v498_v11  ;;  %v2225_v11 = vld [vmem:[%s2331_s2] ss:$0 sm:$0xff] }
  0xa4   : > { %1647 = vmatprep.mubr.msk.bf16.mxu0 %vm633_vm4, %v546_v25 }
  0xa5   : > { %1648 = vmatmul.mubr.msk.bf16.gmra.mxu0 %vm633_vm4, %v548_v12 }
  0xa6   : > { %v589_v18 = vpop.permute.xlu0 %588  ;;  %v591_v13 = vpop.permute.xlu1 %590 }
  0xa7   : > { %v601_v19 = vsel %vm513_vm2, %v1910_v26, %v589_v18  ;;  %v603_v39 = vsel %vm513_vm2, %v1965_v9, %v591_v13 }
  0xaa   : > { %v597_v57 = vpop.permute.xlu0 %596  ;;  %v450_v10 = vpop.permute.xlu1 %449 }
  0xab   : > { %v605_v20 = vsel %vm538_vm3, %v601_v19, %v597_v57  ;;  %v525_v7 = vsel %vm513_vm2, %v1941_v51, %v450_v10 }
  0xac   : > { %1663 = vmatprep.mubr.msk.bf16.mxu1 %vm633_vm4, %v605_v20 }
  0xae   : > { %v599_v22 = vpop.permute.xlu0 %598  ;;  %v452_v23 = vpop.permute.xlu1 %451 }
  0xaf   : > { %v607_v6 = vsel %vm538_vm3, %v603_v39, %v599_v22  ;;  %v527_v24 = vsel %vm513_vm2, %v1995_v34, %v452_v23 }
  0xb0   : > { %1664 = vmatmul.mubr.msk.bf16.gmra.mxu1 %vm633_vm4, %v607_v6 }
  0xb2   : > { %v500_v27 = vpop.permute.xlu0 %499  ;;  %v502_v28 = vpop.permute.xlu1 %501 }
  0xb3   : > { %v550_v29 = vsel %vm538_vm3, %v525_v7, %v500_v27  ;;  %v552_v21 = vsel %vm538_vm3, %v527_v24, %v502_v28 }
  0xb4   : > { %1651 = vmatprep.mubr.msk.bf16.mxu0 %vm633_vm4, %v550_v29 }
  0xb5   : > { %1652 = vmatmul.mubr.msk.bf16.gmra.mxu0 %vm633_vm4, %v552_v21 }
  0xb6   : > { %1703 = vmatprep.mubr.msk.bf16.mxu0 %vm633_vm4, %v2090_v52  ;;  %v440_v32 = vpop.permute.xlu0 %439  ;;  %v490_v30 = vpop.permute.xlu1 %489 }
  0xb7   : > { %v515_v51 = vsel %vm513_vm2, %v2012_v48, %v440_v32 }
  0xb8   : > { %v540_v34 = vsel %vm538_vm3, %v515_v51, %v490_v30 }
  0xb9   : > { %1673 = vmatprep.mubr.msk.bf16.mxu1 %vm633_vm4, %v540_v34 }
  0xba   : > { %1674 = vmatmul.mubr.msk.bf16.vlgmr.msra.gmra.mxu1 %vm633_vm4, %v2070_v17  ;;  %v462_v31 = vpop.permute.xlu0 %461  ;;  %v512_v33 = vpop.permute.xlu1 %511 }
  0xbb   : > { %1677 = vmatprep.mubr.msk.bf16.mxu1 %vm633_vm4, %v2090_v52  ;;  %v537_v35 = vsel %vm513_vm2, %v1910_v26, %v462_v31 }
  0xbc   : > { %v562_v15 = vsel %vm538_vm3, %v537_v35, %v512_v33 }
  0xbd   : > { %1704 = vmatmul.mubr.msk.bf16.vlgmr.msra.gmra.mxu0 %vm633_vm4, %v546_v25 }
  0xbe   : > { %1707 = vmatprep.mubr.msk.bf16.mxu0 %vm633_vm4, %v548_v12  ;;  %v958_v48 = vpop.permute.xlu0 %957  ;;  %v960_v36 = vpop.permute.xlu1 %959 }
  0xbf   : > { %v970_v37 = vsel %vm513_vm2, %v1965_v9, %v958_v48  ;;  %v972_v38 = vsel %vm513_vm2, %v2021_v56, %v960_v36 }
  0xc2   : > { %1678 = vmatmul.mubr.msk.bf16.gmra.mxu1 %vm633_vm4, %v546_v25  ;;  %v966_v40 = vpop.permute.xlu0 %965  ;;  %v968_v41 = vpop.permute.xlu1 %967 }
  0xc3   : > { %1681 = vmatprep.mubr.msk.bf16.mxu1 %vm633_vm4, %v548_v12  ;;  %v974_v26 = vsel %vm538_vm3, %v970_v37, %v966_v40  ;;  %v976_v42 = vsel %vm538_vm3, %v972_v38, %v968_v41 }
  0xc5   : > { %1708 = vmatmul.mubr.msk.bf16.gmra.mxu0 %vm633_vm4, %v550_v29 }
  0xc6   : > { %1711 = vmatprep.mubr.msk.bf16.mxu0 %vm633_vm4, %v552_v21 }
  0xca   : > { %1682 = vmatmul.mubr.msk.bf16.gmra.mxu1 %vm633_vm4, %v550_v29 }
  0xcb   : > { %1685 = vmatprep.mubr.msk.bf16.mxu1 %vm633_vm4, %v552_v21 }
  0xcd   : > { %1712 = vmatmul.mubr.msk.bf16.gmra.mxu0 %vm633_vm4, %v2073_v45 }
  0xce   : > { %1715 = vmatprep.mubr.msk.bf16.mxu0 %vm633_vm4, %v2093_v53 }
  0xd2   : > { %1686 = vmatmul.mubr.msk.bf16.gmra.mxu1 %vm633_vm4, %v2073_v45 }
  0xd3   : > { %1689 = vmatprep.mubr.msk.bf16.mxu1 %vm633_vm4, %v2093_v53 }
  0xd5   : > { %1716 = vmatmul.mubr.msk.bf16.gmra.mxu0 %vm633_vm4, %v2110_v0 }
  0xd6   : > { %1719 = vmatprep.mubr.msk.bf16.mxu0 %vm633_vm4, %v2117_v3 }
  0xda   : > { %1690 = vmatmul.mubr.msk.bf16.gmra.mxu1 %vm633_vm4, %v2110_v0 }
  0xdb   : > { %1693 = vmatprep.mubr.msk.bf16.mxu1 %vm633_vm4, %v2117_v3 }
  0xdd   : > { %1720 = vmatmul.mubr.msk.bf16.gmra.mxu0 %vm633_vm4, %v605_v20 }
  0xde   : > { %1723 = vmatprep.mubr.msk.bf16.mxu0 %vm633_vm4, %v974_v26 }
  0xe2   : > { %1694 = vmatmul.mubr.msk.bf16.gmra.mxu1 %vm633_vm4, %v562_v15 }
  0xe5   : > { %1724 = vmatmul.mubr.msk.bf16.gmra.mxu0 %vm633_vm4, %v976_v42 }
 0x155   : > { %v2192_v9 = vpop.f32.mrf.mxu1  ;;  %v1645_v44 = vpop.f32.mrf.mxu0 }
 0x157   : > { %v2194_v56 = vpop.f32.mrf.mxu1  ;;  %v692_v17 = vpop.f32.mrf.mxu0 }
 0x159   : > { %v2196_v43 = vpop.f32.mrf.mxu1  ;;  %v1646_v46 = vpop.f32.mrf.mxu0 }
 0x15b   : > { %v2198_v45 = vpop.f32.mrf.mxu1  ;;  %v695_v4 = vpop.f32.mrf.mxu0 }
 0x160   : > { %v2200_v47 = vpop.f32.mrf.mxu1 }
 0x162   : > { %v2202_v14 = vpop.f32.mrf.mxu1 }
 0x164   : > { %v2204_v50 = vpop.f32.mrf.mxu1 }
 0x165   : > { %v1649_v49 = vpop.f32.mrf.mxu0 }
 0x166   : > { %v2206_v53 = vpop.f32.mrf.mxu1 }
 0x167   : > { %v708_v52 = vpop.f32.mrf.mxu0 }
 0x169   : > { %v1650_v2 = vpop.f32.mrf.mxu0 }
 0x16b   : > { %v711_v55 = vpop.f32.mrf.mxu0 }
 0x170   : > { %v2208_v8 = vpop.f32.mrf.mxu1 }
 0x172   : > { %v2210_v54 = vpop.f32.mrf.mxu1 }
 0x174   : > { %v2212_v58 = vpop.f32.mrf.mxu1 }
 0x175   : > { %v1653_v59 = vpop.f32.mrf.mxu0 }
 0x176   : > { %v2216_v0 = vpop.f32.mrf.mxu1 }
 0x177   : > { %v2214_v60 = vpop.f32.mrf.mxu0 }
 0x179   : > { %v2218_v16 = vpop.f32.mrf.mxu0 }
 0x17a   : > { %v1675_v61 = vpop.f32.mrf.mxu1 }
 0x17b   : > { %v852_v62 = vadd.f32 %v1675_v61, %v1645_v44  ;;  %v2220_v3 = vpop.f32.mrf.mxu0 }
 0x17c   : > { %v843_v63 = vpop.f32.mrf.mxu1 }
 0x17d   : > { %v844_v1 = vadd.f32 %v843_v63, %v692_v17  ;;  %v1705_v5 = vpop.f32.mrf.mxu0 }
 0x17e   : > { %v1137_v25 = vadd.f32 %v1705_v5, %v852_v62  ;;  %v1676_v12 = vpop.f32.mrf.mxu1 }
 0x17f   : > { %v855_v18 = vadd.f32 %v1676_v12, %v1646_v46  ;;  %v1040_v13 = vpop.f32.mrf.mxu0 }
 0x180   : > { %v1168_v19 = vadd.f32 %v2225_v11, %v1137_v25  ;;  %v1135_v57 = vadd.f32 %v1040_v13, %v844_v1  ;;  %v846_v10 = vpop.f32.mrf.mxu1 }
 0x181   : > { %v847_v20 = vadd.f32 %v846_v10, %v695_v4  ;;  %v1706_v39 = vpop.f32.mrf.mxu0 }
 0x182   : > { %v1192_v22 = vmax.f32 %v1168_v19, 0.0  ;;  %v1166_v23 = vadd.f32 %v2225_v11, %v1135_v57  ;;  %v1138_v6 = vadd.f32 %v1706_v39, %v855_v18  ;;  %v1679_v7 = vpop.f32.mrf.mxu1 }
 0x183   : > { %v868_v24 = vadd.f32 %v1679_v7, %v1649_v49  ;;  %v1043_v27 = vpop.f32.mrf.mxu0 }
 0x184   : > { %v1570_v28 = vpack.c.bf16 %v1192_v22, %v1192_v22  ;;  %v1190_v29 = vmax.f32 %v1166_v23, 0.0  ;;  %v1169_v21 = vadd.f32 %v2225_v11, %v1138_v6  ;;  %v1136_v32 = vadd.f32 %v1043_v27, %v847_v20  ;;  %v859_v30 = vpop.f32.mrf.mxu1 }
 0x185   : > { %v860_v51 = vadd.f32 %v859_v30, %v708_v52  ;;  %v1709_v34 = vpop.f32.mrf.mxu0 }
 0x186   : > { %1313 = vst.msk [vmem:[%s2233_s22 + $0x8] sm:$0xf] %vm1310_vm5, %v1570_v28  ;;  %v1568_v31 = vpack.c.bf16 %v1190_v29, %v1190_v29  ;;  %v1193_v33 = vmax.f32 %v1169_v21, 0.0  ;;  %v1167_v35 = vadd.f32 %v2225_v11, %v1136_v32  ;;  %v1141_v15 = vadd.f32 %v1709_v34, %v868_v24  ;;  %v1680_v48 = vpop.f32.mrf.mxu1 }
 0x187   : > { %v871_v36 = vadd.f32 %v1680_v48, %v1650_v2  ;;  %v1056_v37 = vpop.f32.mrf.mxu0 }
 0x188   : > { %1311 = vst.msk [vmem:[%s2233_s22] sm:$0xf] %vm1310_vm5, %v1568_v31  ;;  %v1571_v38 = vpack.c.bf16 %v1193_v33, %v1193_v33  ;;  %v1191_v40 = vmax.f32 %v1167_v35, 0.0  ;;  %v1172_v41 = vadd.f32 %v2225_v11, %v1141_v15  ;;  %v1139_v26 = vadd.f32 %v1056_v37, %v860_v51  ;;  %v862_v42 = vpop.f32.mrf.mxu1 }
 0x189   : > { %v863_v44 = vadd.f32 %v862_v42, %v711_v55  ;;  %v1710_v17 = vpop.f32.mrf.mxu0 }
 0x18a   : > { %1314 = vst.msk [vmem:[%s2233_s22 + $0xc] sm:$0xf] %vm1310_vm5, %v1571_v38  ;;  %v1569_v46 = vpack.c.bf16 %v1191_v40, %v1191_v40  ;;  %v1196_v4 = vmax.f32 %v1172_v41, 0.0  ;;  %v1170_v49 = vadd.f32 %v2225_v11, %v1139_v26  ;;  %v1142_v52 = vadd.f32 %v1710_v17, %v871_v36  ;;  %v1683_v2 = vpop.f32.mrf.mxu1 }
 0x18b   : > { %v884_v61 = vadd.f32 %v1683_v2, %v1653_v59  ;;  %v1059_v62 = vpop.f32.mrf.mxu0 }
 0x18c   : > { %1312 = vst.msk [vmem:[%s2233_s22 + $0x4] sm:$0xf] %vm1310_vm5, %v1569_v46  ;;  %v1574_v63 = vpack.c.bf16 %v1196_v4, %v1196_v4  ;;  %v1194_v1 = vmax.f32 %v1170_v49, 0.0  ;;  %v1173_v5 = vadd.f32 %v2225_v11, %v1142_v52  ;;  %v1140_v55 = vadd.f32 %v1059_v62, %v863_v44  ;;  %v875_v25 = vpop.f32.mrf.mxu1 }
 0x18d   : > { %v876_v12 = vadd.f32 %v875_v25, %v2214_v60  ;;  %v1713_v18 = vpop.f32.mrf.mxu0 }
 0x18e   : > { %1317 = vst.msk [vmem:[%s2233_s22 + $0x18] sm:$0xf] %vm1310_vm5, %v1574_v63  ;;  %v1572_v13 = vpack.c.bf16 %v1194_v1, %v1194_v1  ;;  %v1197_v19 = vmax.f32 %v1173_v5, 0.0  ;;  %v1171_v59 = vadd.f32 %v2225_v11, %v1140_v55  ;;  %v1145_v57 = vadd.f32 %v1713_v18, %v884_v61  ;;  %v1684_v10 = vpop.f32.mrf.mxu1 }
 0x18f   : > { %v887_v20 = vadd.f32 %v1684_v10, %v2218_v16  ;;  %v1072_v39 = vpop.f32.mrf.mxu0 }
 0x190   : > { %1315 = vst.msk [vmem:[%s2233_s22 + $0x10] sm:$0xf] %vm1310_vm5, %v1572_v13  ;;  %v1575_v22 = vpack.c.bf16 %v1197_v19, %v1197_v19  ;;  %v1195_v23 = vmax.f32 %v1171_v59, 0.0  ;;  %v1176_v60 = vadd.f32 %v2225_v11, %v1145_v57  ;;  %v1143_v6 = vadd.f32 %v1072_v39, %v876_v12  ;;  %v878_v7 = vpop.f32.mrf.mxu1 }
 0x191   : > { %v879_v24 = vadd.f32 %v878_v7, %v2220_v3  ;;  %v1714_v27 = vpop.f32.mrf.mxu0 }
 0x192   : > { %1318 = vst.msk [vmem:[%s2233_s22 + $0x1c] sm:$0xf] %vm1310_vm5, %v1575_v22  ;;  %v1573_v28 = vpack.c.bf16 %v1195_v23, %v1195_v23  ;;  %v1200_v29 = vmax.f32 %v1176_v60, 0.0  ;;  %v1174_v16 = vadd.f32 %v2225_v11, %v1143_v6  ;;  %v1146_v21 = vadd.f32 %v1714_v27, %v887_v20  ;;  %v1687_v32 = vpop.f32.mrf.mxu1 }
 0x193   : > { %v900_v30 = vadd.f32 %v1687_v32, %v2192_v9  ;;  %v1075_v51 = vpop.f32.mrf.mxu0 }
 0x194   : > { %1316 = vst.msk [vmem:[%s2233_s22 + $0x14] sm:$0xf] %vm1310_vm5, %v1573_v28  ;;  %v1578_v34 = vpack.c.bf16 %v1200_v29, %v1200_v29  ;;  %v1198_v31 = vmax.f32 %v1174_v16, 0.0  ;;  %v1177_v3 = vadd.f32 %v2225_v11, %v1146_v21  ;;  %v1144_v33 = vadd.f32 %v1075_v51, %v879_v24  ;;  %v891_v35 = vpop.f32.mrf.mxu1 }
 0x195   : > { %v892_v15 = vadd.f32 %v891_v35, %v2194_v56  ;;  %v1717_v48 = vpop.f32.mrf.mxu0 }
 0x196   : > { %1321 = vst.msk [vmem:[%s2233_s22 + $0x28] sm:$0xf] %vm1310_vm5, %v1578_v34  ;;  %v1576_v36 = vpack.c.bf16 %v1198_v31, %v1198_v31  ;;  %v1201_v37 = vmax.f32 %v1177_v3, 0.0  ;;  %v1175_v9 = vadd.f32 %v2225_v11, %v1144_v33  ;;  %v1149_v38 = vadd.f32 %v1717_v48, %v900_v30  ;;  %v1688_v40 = vpop.f32.mrf.mxu1 }
 0x197   : > { %v903_v41 = vadd.f32 %v1688_v40, %v2196_v43  ;;  %v1088_v26 = vpop.f32.mrf.mxu0 }
 0x198   : > { %1319 = vst.msk [vmem:[%s2233_s22 + $0x20] sm:$0xf] %vm1310_vm5, %v1576_v36  ;;  %v1579_v42 = vpack.c.bf16 %v1201_v37, %v1201_v37  ;;  %v1199_v44 = vmax.f32 %v1175_v9, 0.0  ;;  %v1180_v56 = vadd.f32 %v2225_v11, %v1149_v38  ;;  %v1147_v17 = vadd.f32 %v1088_v26, %v892_v15  ;;  %v894_v46 = vpop.f32.mrf.mxu1 }
 0x199   : > { %v895_v4 = vadd.f32 %v894_v46, %v2198_v45  ;;  %v1718_v49 = vpop.f32.mrf.mxu0 }
 0x19a   : > { %1322 = vst.msk [vmem:[%s2233_s22 + $0x2c] sm:$0xf] %vm1310_vm5, %v1579_v42  ;;  %v1577_v52 = vpack.c.bf16 %v1199_v44, %v1199_v44  ;;  %v1204_v2 = vmax.f32 %v1180_v56, 0.0  ;;  %v1178_v43 = vadd.f32 %v2225_v11, %v1147_v17  ;;  %v1150_v61 = vadd.f32 %v1718_v49, %v903_v41  ;;  %v1691_v62 = vpop.f32.mrf.mxu1 }
 0x19b   : > { %v916_v63 = vadd.f32 %v1691_v62, %v2200_v47  ;;  %v1091_v1 = vpop.f32.mrf.mxu0 }
 0x19c   : > { %1320 = vst.msk [vmem:[%s2233_s22 + $0x24] sm:$0xf] %vm1310_vm5, %v1577_v52  ;;  %v1582_v5 = vpack.c.bf16 %v1204_v2, %v1204_v2  ;;  %v1202_v55 = vmax.f32 %v1178_v43, 0.0  ;;  %v1181_v45 = vadd.f32 %v2225_v11, %v1150_v61  ;;  %v1148_v25 = vadd.f32 %v1091_v1, %v895_v4  ;;  %v907_v12 = vpop.f32.mrf.mxu1 }
 0x19d   : > { %v908_v18 = vadd.f32 %v907_v12, %v2202_v14  ;;  %v1721_v13 = vpop.f32.mrf.mxu0 }
 0x19e   : > { %1325 = vst.msk [vmem:[%s2233_s22 + $0x38] sm:$0xf] %vm1310_vm5, %v1582_v5  ;;  %v1580_v19 = vpack.c.bf16 %v1202_v55, %v1202_v55  ;;  %v1205_v59 = vmax.f32 %v1181_v45, 0.0  ;;  %v1179_v47 = vadd.f32 %v2225_v11, %v1148_v25  ;;  %v1153_v57 = vadd.f32 %v1721_v13, %v916_v63  ;;  %v1692_v10 = vpop.f32.mrf.mxu1 }
 0x19f   : > { %v919_v20 = vadd.f32 %v1692_v10, %v2204_v50  ;;  %v1104_v39 = vpop.f32.mrf.mxu0 }
 0x1a0   : > { %1323 = vst.msk [vmem:[%s2233_s22 + $0x30] sm:$0xf] %vm1310_vm5, %v1580_v19  ;;  %v1583_v22 = vpack.c.bf16 %v1205_v59, %v1205_v59  ;;  %v1203_v23 = vmax.f32 %v1179_v47, 0.0  ;;  %v1184_v14 = vadd.f32 %v2225_v11, %v1153_v57  ;;  %v1151_v60 = vadd.f32 %v1104_v39, %v908_v18  ;;  %v910_v6 = vpop.f32.mrf.mxu1 }
 0x1a1   : > { %v911_v7 = vadd.f32 %v910_v6, %v2206_v53  ;;  %v1722_v24 = vpop.f32.mrf.mxu0 }
 0x1a2   : > { %1326 = vst.msk [vmem:[%s2233_s22 + $0x3c] sm:$0xf] %vm1310_vm5, %v1583_v22  ;;  %v1581_v27 = vpack.c.bf16 %v1203_v23, %v1203_v23  ;;  %v1208_v28 = vmax.f32 %v1184_v14, 0.0  ;;  %v1182_v50 = vadd.f32 %v2225_v11, %v1151_v60  ;;  %v1154_v29 = vadd.f32 %v1722_v24, %v919_v20  ;;  %v1695_v16 = vpop.f32.mrf.mxu1 }
 0x1a3   : > { %v932_v21 = vadd.f32 %v1695_v16, %v2208_v8  ;;  %v1107_v32 = vpop.f32.mrf.mxu0 }
 0x1a4   : > { %1324 = vst.msk [vmem:[%s2233_s22 + $0x34] sm:$0xf] %vm1310_vm5, %v1581_v27  ;;  %v1586_v30 = vpack.c.bf16 %v1208_v28, %v1208_v28  ;;  %v1206_v51 = vmax.f32 %v1182_v50, 0.0  ;;  %v1185_v53 = vadd.f32 %v2225_v11, %v1154_v29  ;;  %v1152_v34 = vadd.f32 %v1107_v32, %v911_v7  ;;  %v923_v31 = vpop.f32.mrf.mxu1 }
 0x1a5   : > { %v924_v3 = vadd.f32 %v923_v31, %v2210_v54  ;;  %v1725_v33 = vpop.f32.mrf.mxu0 }
 0x1a6   : > { %1329 = vst.msk [vmem:[%s2233_s22 + $0x48] sm:$0xf] %vm1310_vm5, %v1586_v30  ;;  %v1584_v35 = vpack.c.bf16 %v1206_v51, %v1206_v51  ;;  %v1209_v15 = vmax.f32 %v1185_v53, 0.0  ;;  %v1183_v8 = vadd.f32 %v2225_v11, %v1152_v34  ;;  %v1157_v48 = vadd.f32 %v1725_v33, %v932_v21  ;;  %v1696_v36 = vpop.f32.mrf.mxu1 }
 0x1a7   : > { %v935_v37 = vadd.f32 %v1696_v36, %v2212_v58  ;;  %v1120_v9 = vpop.f32.mrf.mxu0 }
 0x1a8   : > { %1327 = vst.msk [vmem:[%s2233_s22 + $0x40] sm:$0xf] %vm1310_vm5, %v1584_v35  ;;  %v1587_v38 = vpack.c.bf16 %v1209_v15, %v1209_v15  ;;  %v1207_v40 = vmax.f32 %v1183_v8, 0.0  ;;  %v1188_v54 = vadd.f32 %v2225_v11, %v1157_v48  ;;  %v1155_v41 = vadd.f32 %v1120_v9, %v924_v3  ;;  %v926_v26 = vpop.f32.mrf.mxu1 }
 0x1a9   : > { %v927_v42 = vadd.f32 %v926_v26, %v2216_v0  ;;  %v1726_v44 = vpop.f32.mrf.mxu0 }
 0x1aa   : > { %1330 = vst.msk [vmem:[%s2233_s22 + $0x4c] sm:$0xf] %vm1310_vm5, %v1587_v38  ;;  %v1585_v56 = vpack.c.bf16 %v1207_v40, %v1207_v40  ;;  %v1212_v17 = vmax.f32 %v1188_v54, 0.0  ;;  %v1186_v58 = vadd.f32 %v2225_v11, %v1155_v41  ;;  %v1158_v46 = vadd.f32 %v1726_v44, %v935_v37 }
 0x1ab   : > { %v1123_v4 = vpop.f32.mrf.mxu0 }
 0x1ac   : > { %1328 = vst.msk [vmem:[%s2233_s22 + $0x44] sm:$0xf] %vm1310_vm5, %v1585_v56  ;;  %v1590_v49 = vpack.c.bf16 %v1212_v17, %v1212_v17  ;;  %v1210_v52 = vmax.f32 %v1186_v58, 0.0  ;;  %v1189_v2 = vadd.f32 %v2225_v11, %v1158_v46  ;;  %v1156_v43 = vadd.f32 %v1123_v4, %v927_v42 }
 0x1ae   : > { %1333 = vst.msk [vmem:[%s2233_s22 + $0x58] sm:$0xf] %vm1310_vm5, %v1590_v49  ;;  %v1588_v0 = vpack.c.bf16 %v1210_v52, %v1210_v52  ;;  %v1213_v61 = vmax.f32 %v1189_v2, 0.0  ;;  %v1187_v62 = vadd.f32 %v2225_v11, %v1156_v43 }
 0x1b0   : > { %1331 = vst.msk [vmem:[%s2233_s22 + $0x50] sm:$0xf] %vm1310_vm5, %v1588_v0  ;;  %v1591_v63 = vpack.c.bf16 %v1213_v61, %v1213_v61  ;;  %v1211_v1 = vmax.f32 %v1187_v62, 0.0 }
 0x1b2   : > { %1334 = vst.msk [vmem:[%s2233_s22 + $0x5c] sm:$0xf] %vm1310_vm5, %v1591_v63  ;;  %v1589_v5 = vpack.c.bf16 %v1211_v1, %v1211_v1 }
 0x1b4   : > { %1332 = vst.msk [vmem:[%s2233_s22 + $0x54] sm:$0xf] %vm1310_vm5, %v1589_v5 }
 0x1b5 PF: > { %s13_s14 = sadd.s32 1, %s1809_s14   ;;  %s2333_s12 = smov %s1805_s13 }
 0x1b6   : > { %p10_p5 = scmp.ge.s32.totalorder %s13_s14, 4   ;;  %s2334_s13 = smov %s2336_s15 }
 0x1b8   :  { %12 = sbr.rel (!%p10_p5) target bundleno = 2 (0x2), region = 71 }

</bundles_post_ra>
